<compile_context>
chip_gen: v6e
topology: v6e:2x2x1
jax: 0.10.0
libtpu: 0.0.40
codegen_flags: <defaults>
</compile_context>

<pallas_src>
import functools

import jax
import jax.numpy as jnp
from jax import lax
from jax.experimental import pallas as pl
from jax.experimental.pallas import tpu as pltpu


def _tv_denoise_kernel(clean_ref, noisy_ref, loss_ref, *, width, plane,
                       inv_n, tv_weight):
    # clean_ref / noisy_ref: (TB, C*H*W) blocks; each sublane row is one
    # row-major-flattened image (k = c*H*W + h*W + w).
    # Upcast kept on purpose: inputs may be bf16 (halves HBM bytes); all math f32.
    c = clean_ref[...].astype(jnp.float32)
    n = noisy_ref[...].astype(jnp.float32)

    # ---- L2 term, pre-scaled per element so one reduction yields the mean.
    d = c - n
    contrib = d * d * jnp.float32(inv_n)

    # ---- Total variation via lane rolls (XLU slot; result[k] = x[k - shift]):
    #   shift=W -> pixel directly above, valid when (k mod H*W) >= W
    #   shift=1 -> pixel to the left,    valid when (k mod W)   != 0
    dh = jnp.abs(c - pltpu.roll(c, shift=width, axis=1))
    dw = jnp.abs(c - pltpu.roll(c, shift=1, axis=1))

    # One shared lane-index iota supplies both wrap masks.
    lane = lax.broadcasted_iota(jnp.int32, c.shape, 1)
    if plane & (plane - 1) == 0:          # power of two -> single bit-and
        row_ok = (lane & (plane - 1)) >= width
    else:
        row_ok = (lane % plane) >= width
    if width & (width - 1) == 0:
        col_ok = (lane & (width - 1)) != 0
    else:
        col_ok = (lane % width) != 0

    zero = jnp.float32(0.0)
    tv = jnp.where(row_ok, dh, zero) + jnp.where(col_ok, dw, zero)

    # Single fused lane-axis reduction -> per-image loss (TB, 1).
    loss_ref[...] = jnp.sum(contrib + jnp.float32(tv_weight) * tv,
                            axis=1, keepdims=True)


def _pick_images_per_block(batch, chw, itemsize, target_bytes=1 << 20):
    """Images per grid block: ~1 MB input blocks, multiple of 8, divides batch."""
    if batch <= 8:
        return batch
    tb = min(batch, max(8, target_bytes // max(1, chw * itemsize)))
    tb -= tb % 8
    tb = max(tb, 8)
    while tb > 8 and batch % tb != 0:
        tb -= 8
    return tb if batch % tb == 0 else batch


def tv_denoise_batched(clean, noisy, *, tv_weight=1e-4, images_per_block=None):
    """Per-image losses for (B, C, H, W) inputs: MSE(clean,noisy) + w*TV(clean)."""
    B, C, H, W = clean.shape
    chw = C * H * W
    clean_flat = clean.reshape(B, chw)
    noisy_flat = noisy.reshape(B, chw)
    itemsize = jnp.dtype(clean_flat.dtype).itemsize

    if images_per_block is None:
        tb = _pick_images_per_block(B, chw, itemsize)
    else:
        tb = images_per_block
        assert B % tb == 0 and (tb % 8 == 0 or tb == B), (B, tb)
    grid = (B // tb,)

    kernel = functools.partial(
        _tv_denoise_kernel,
        width=W,
        plane=H * W,
        inv_n=1.0 / float(chw),
        tv_weight=tv_weight,
    )
    # Advisory cost hint: ~12 VPU ops/element, pure streaming, no transcendentals.
    cost = pl.CostEstimate(
        flops=12 * B * chw,
        transcendentals=0,
        bytes_accessed=2 * B * chw * itemsize + B * 4,
    )
    out = pl.pallas_call(
        kernel,
        out_shape=jax.ShapeDtypeStruct((B, 1), jnp.float32),
        grid=grid,
        in_specs=[
            pl.BlockSpec((tb, chw), lambda b: (b, 0)),
            pl.BlockSpec((tb, chw), lambda b: (b, 0)),
        ],
        out_specs=pl.BlockSpec((tb, 1), lambda b: (b, 0)),
        compiler_params=pltpu.CompilerParams(
            dimension_semantics=("parallel",)),   # v7x: shard batch over both TCs
        cost_estimate=cost,
    )(clean_flat, noisy_flat)
    return out[:, 0]


def tv_denoise_forward(clean_image, noisy_image):
    """Scalar loss for a single (C, H, W) image (the module's forward())."""
    return tv_denoise_batched(clean_image[None], noisy_image[None])[0]


def _reference_forward(clean, noisy):
    """Pure-JAX reference matching the PyTorch/kornia semantics."""
    mse = jnp.mean((clean - noisy) ** 2)
    tv = (jnp.sum(jnp.abs(clean[:, 1:, :] - clean[:, :-1, :]))
          + jnp.sum(jnp.abs(clean[:, :, 1:] - clean[:, :, :-1])))
    return mse + 1e-4 * tv


# TODO(synk): the tutorial's SGD loop updating the `clean_image` Parameter is
# host-side training code; a fused fwd+bwd+update kernel (jax.custom_vjp) would
# amortize launch overhead further but is out of scope for this forward pass.

if __name__ == "__main__":
    key = jax.random.PRNGKey(0)
    C, H, W = 3, 16, 16
    k_noise, k_perturb, k_batch = jax.random.split(key, 3)

    # Module semantics: clean_image parameter initialized as noisy_image.clone().
    noisy_image = jax.random.uniform(k_noise, (C, H, W), dtype=jnp.float32)
    clean_init = noisy_image                      # clone -> MSE term exactly zero
    clean_mid = noisy_image + 0.05 * jax.random.normal(
        k_perturb, (C, H, W), dtype=jnp.float32)  # mid-optimization state

    # 1) Single-image forward (exact module semantics).
    for clean in (clean_init, clean_mid):
        loss = jax.block_until_ready(tv_denoise_forward(clean, noisy_image))
        ref = _reference_forward(clean, noisy_image)
        assert jnp.allclose(loss, ref, rtol=1e-5, atol=1e-5), (loss, ref)

    # 2) Batched forward: 16 images, 8 per block -> grid=(2,), batch axis parallel.
    B = 16
    kc, kn = jax.random.split(k_batch)
    noisy_b = jax.random.uniform(kn, (B, C, H, W), dtype=jnp.float32)
    clean_b = noisy_b + 0.05 * jax.random.normal(kc, (B, C, H, W), jnp.float32)
    losses = jax.block_until_ready(
        tv_denoise_batched(clean_b, noisy_b, images_per_block=8))
    refs = jax.vmap(_reference_forward)(clean_b, noisy_b)
    assert losses.shape == (B,)
    assert jnp.allclose(losses, refs, rtol=1e-5, atol=1e-5), (losses, refs)

    # 3) bf16 inputs (half the HBM traffic when batched); in-kernel math stays f32.
    clean_bf = clean_b.astype(jnp.bfloat16)
    noisy_bf = noisy_b.astype(jnp.bfloat16)
    losses_bf = jax.block_until_ready(
        tv_denoise_batched(clean_bf, noisy_bf, images_per_block=8))
    refs_bf = jax.vmap(_reference_forward)(
        clean_bf.astype(jnp.float32), noisy_bf.astype(jnp.float32))
    assert jnp.allclose(losses_bf, refs_bf, rtol=1e-4, atol=1e-5), (losses_bf, refs_bf)

    print("KERNEL_OK")
</pallas_src>

<mosaic_0001>
module attributes {stable_mosaic.version = 11 : i64} {
  func.func @_tv_denoise_kernel(%arg0: i32, %arg1: memref<1x768xf32, #tpu.memory_space<vmem>>, %arg2: memref<1x768xf32, #tpu.memory_space<vmem>>, %arg3: memref<1x1xf32, #tpu.memory_space<vmem>>) attributes {dimension_semantics = [#tpu.dimension_semantics<parallel>], iteration_bounds = array<i64: 1>, scalar_prefetch = 0 : i64, scratch_operands = 0 : i64, tpu.core_type = #tpu.core_type<tc>, window_params = [{transform_indices = @transform_0, window_bounds = array<i64: 1, 768>}, {transform_indices = @transform_1, window_bounds = array<i64: 1, 768>}, {transform_indices = @transform_2, window_bounds = array<i64: 1, 1>}]} {
    %c0 = arith.constant 0 : index
    %c0_0 = arith.constant 0 : index
    %0 = vector.load %arg1[%c0, %c0_0] : memref<1x768xf32, #tpu.memory_space<vmem>>, vector<1x768xf32>
    %c0_1 = arith.constant 0 : index
    %c0_2 = arith.constant 0 : index
    %1 = vector.load %arg2[%c0_1, %c0_2] : memref<1x768xf32, #tpu.memory_space<vmem>>, vector<1x768xf32>
    %2 = arith.subf %0, %1 : vector<1x768xf32>
    %3 = arith.mulf %2, %2 : vector<1x768xf32>
    %cst = arith.constant 0.00130208337 : f32
    %4 = vector.broadcast %cst : f32 to vector<1x768xf32>
    %5 = arith.mulf %3, %4 : vector<1x768xf32>
    %c16_i32 = arith.constant 16 : i32
    %6 = tpu.dynamic_rotate %0 by %c16_i32 dim 1 : vector<1x768xf32>, i32 -> vector<1x768xf32>
    %7 = arith.subf %0, %6 : vector<1x768xf32>
    %8 = math.absf %7 : vector<1x768xf32>
    %c1_i32 = arith.constant 1 : i32
    %9 = tpu.dynamic_rotate %0 by %c1_i32 dim 1 : vector<1x768xf32>, i32 -> vector<1x768xf32>
    %10 = arith.subf %0, %9 : vector<1x768xf32>
    %11 = math.absf %10 : vector<1x768xf32>
    %12 = tpu.iota {dimensions = array<i32: 1>} : vector<1x768xi32>
    %c255_i32 = arith.constant 255 : i32
    %13 = vector.broadcast %c255_i32 : i32 to vector<1x768xi32>
    %14 = arith.andi %12, %13 : vector<1x768xi32>
    %c16_i32_3 = arith.constant 16 : i32
    %15 = vector.broadcast %c16_i32_3 : i32 to vector<1x768xi32>
    %16 = arith.cmpi sge, %14, %15 : vector<1x768xi32>
    %c15_i32 = arith.constant 15 : i32
    %17 = vector.broadcast %c15_i32 : i32 to vector<1x768xi32>
    %18 = arith.andi %12, %17 : vector<1x768xi32>
    %c0_i32 = arith.constant 0 : i32
    %19 = vector.broadcast %c0_i32 : i32 to vector<1x768xi32>
    %20 = arith.cmpi ne, %18, %19 : vector<1x768xi32>
    %cst_4 = arith.constant 0.000000e+00 : f32
    %21 = vector.broadcast %cst_4 : f32 to vector<1x768xf32>
    %22 = arith.select %16, %8, %21 : vector<1x768xi1>, vector<1x768xf32>
    %cst_5 = arith.constant 0.000000e+00 : f32
    %23 = vector.broadcast %cst_5 : f32 to vector<1x768xf32>
    %24 = arith.select %20, %11, %23 : vector<1x768xi1>, vector<1x768xf32>
    %25 = arith.addf %22, %24 : vector<1x768xf32>
    %cst_6 = arith.constant 9.99999974E-5 : f32
    %26 = vector.broadcast %cst_6 : f32 to vector<1x768xf32>
    %27 = arith.mulf %26, %25 : vector<1x768xf32>
    %28 = arith.addf %5, %27 : vector<1x768xf32>
    %cst_7 = arith.constant dense<0.000000e+00> : vector<1xf32>
    %29 = vector.multi_reduction <add>, %28, %cst_7 [1] : vector<1x768xf32> to vector<1xf32>
    %30 = vector.shape_cast %29 : vector<1xf32> to vector<1x1xf32>
    %c0_8 = arith.constant 0 : index
    %c0_9 = arith.constant 0 : index
    %31 = vector.load %arg3[%c0_8, %c0_9] : memref<1x1xf32, #tpu.memory_space<vmem>>, vector<1x1xf32>
    tpu.vector_store %arg3[%c0_8, %c0_9], %30 {strides = array<i32>} : memref<1x1xf32, #tpu.memory_space<vmem>>, vector<1x1xf32>,
    return
  }
  func.func @transform_0(%arg0: i32) -> (i32, i32) {
    %c0_i32 = arith.constant 0 : i32
    %c0_i32_0 = arith.constant 0 : i32
    return %arg0, %c0_i32 : i32, i32
  }
  func.func @transform_1(%arg0: i32) -> (i32, i32) {
    %c0_i32 = arith.constant 0 : i32
    %c0_i32_0 = arith.constant 0 : i32
    return %arg0, %c0_i32 : i32, i32
  }
  func.func @transform_2(%arg0: i32) -> (i32, i32) {
    %c0_i32 = arith.constant 0 : i32
    %c0_i32_0 = arith.constant 0 : i32
    return %arg0, %c0_i32 : i32, i32
  }
}

</mosaic_0001>

<bundles_post_ra>
// kernel: tpu_custom_call.1
= control target key start
LH: loop header
LB: loop body
LE: loop exit
PB: predicated region body
PF: predicated region fallthrough
CT: control target
= control target key end

     0   :  { %7 = vsyncpa [#allocation3], 0  ;;  %s685_s0 = inlined_call_operand.hbm [shape: f32[1,768], index: 0, kind: input, shape index: {}]   ;;  %s686_s1 = inlined_call_operand.hbm [shape: f32[1,768], index: 1, kind: input, shape index: {}]   ;;  %s687_s2 = inlined_call_operand.hbm [shape: f32[1,1], index: 2, kind: output, shape index: {}]  }
   0x1   :  { %8 = vsyncpa [#allocation6], 0 }
   0x2   :  { %9 = vsyncpa [#allocation4], 0  ;;  %s508_s9 = smov [#allocation2]   ;;  %s509_s11 = smov [#allocation5]  }
   0x3   :  { %s16_s10 = sshll.u32 %s508_s9, 4  ;;  %s26_s12 = sshll.u32 %s509_s11, 4  ;;  %s17_s10 = int_to_ptr.vmem [resolvable:$true] %s16_s10  ;;  %s27_s12 = int_to_ptr.vmem [resolvable:$true] %s26_s12 }
   0x4   :  { %s450_s13 = scalar_lea.vmem %s17_s10, 96  ;;  %p455_p1 = scmp.lt.s32.totalorder %s17_s10, %s17_s10 }
   0x5   :  { %p451_p0 = scmp.ne.s32.totalorder %s17_s10, %s450_s13  ;;  %p456_p2 = scmp.lt.s32.totalorder %s450_s13, %s450_s13 }
   0x7   :  { %p457_p3 = por %p456_p2, %p455_p1 }
   0x9   :  { %p458_p4 = pnand %p457_p3, %p451_p0 }
   0xb   :  { %461 = shalt.err (!%p458_p4)
}
   0xc   :  { %19 = dma.hbm_to_vmem [thread:$0]  %s685_s0, 96, %s17_s10, [#allocation3]  }
   0xd   :  { %s470_s16 = scalar_lea.vmem %s27_s12, 96  ;;  %p475_p6 = scmp.lt.s32.totalorder %s27_s12, %s27_s12 }
   0xe   :  { %p471_p5 = scmp.ne.s32.totalorder %s27_s12, %s470_s16  ;;  %p476_p7 = scmp.lt.s32.totalorder %s470_s16, %s470_s16 }
  0x10   :  { %p477_p8 = por %p476_p7, %p475_p6 }
  0x12   :  { %p478_p9 = pnand %p477_p8, %p471_p5 }
  0x14   :  { %481 = shalt.err (!%p478_p9)
}
  0x15   :  { %29 = dma.hbm_to_vmem [thread:$0]  %s686_s1, 96, %s27_s12, [#allocation6]  }
  0x16   :  { %502 = dma.done.wait [#allocation3], 96  }
  0x17   :  { %503 = vsyncadd [#allocation3], 4294967200 }
  0x18   :  { %504 = dma.done.wait [#allocation6], 96  }
  0x19   :  { %505 = vsyncadd [#allocation6], 4294967200  ;;  %v42_v0 = vlaneseq  ;;  %v543_v6 = vld [vmem:[#allocation2] sm:$0x3f]  ;;  %s510_s0 = smov 16   ;;  %s511_s1 = smov 1  }
  0x1a   :  { %v512_v15 = vmov 1966171168   ;;  %vm404_vm11 = vcmask 1040384   ;;  %s513_s19 = smov [#allocation7]   ;;  %vm418_vm12 = vcmask 0  }
  0x1b   :  { %v43_v1 = vshrl.u32 %v42_v0, 7  ;;  %v103_v16 = vunpack.c.l.s4 %v512_v15  ;;  %v561_v17 = vand.u32 127, %v42_v0  ;;  %s426_s20 = sshll.u32 %s513_s19, 4  ;;  %s427_s20 = int_to_ptr.vmem [resolvable:$true] %s426_s20 }
  0x1c   :  { %s482_s21 = scalar_lea.vmem %s427_s20, 16  ;;  %s486_s22 = scalar_lea.vmem %s427_s20, 32 }
  0x1d   :  { %v535_v2 = vsub.s32 2, %v43_v1  ;;  %v537_v3 = vsub.s32 0, %v43_v1  ;;  %v539_v4 = vsub.s32 3, %v43_v1  ;;  %v541_v5 = vsub.s32 1, %v43_v1  ;;  %p483_p10 = scmp.ne.s32.totalorder %s427_s20, %s482_s21  ;;  %p487_p11 = scmp.lt.s32.totalorder %s427_s20, %s427_s20 }
  0x1e   :  { %v553_v11 = vsub.s32 5, %v43_v1  ;;  %v557_v13 = vsub.s32 4, %v43_v1  ;;  %v104_v18 = vunpack.c.0.s8 %v103_v16  ;;  %vm86_vm0 = vcmp.lt.s32.totalorder %v561_v17, 16  ;;  %p488_p12 = scmp.lt.s32.totalorder %s486_s22, %s482_s21 }
  0x1f   :  { %v53_v7 = vrot.slane %v543_v6, %v535_v2  ;;  %v45_v8 = vrot.slane %v543_v6, %v537_v3  ;;  %v57_v9 = vrot.slane %v543_v6, %v539_v4  ;;  %v49_v10 = vrot.slane %v543_v6, %v541_v5 }
  0x20   :  { %v65_v12 = vrot.slane %v543_v6, %v553_v11  ;;  %v61_v14 = vrot.slane %v543_v6, %v557_v13  ;;  %v564_v21 = vsub.s32 %v104_v18, %v43_v1  ;;  %vm154_vm1 = vcmp.lt.s32.totalorder %v561_v17, 1  ;;  %p489_p13 = por %p488_p12, %p487_p11 }
  0x21   :  { %76 = vrot.lane.b32.xlu1 %v53_v7, %s510_s0  ;;  %72 = vrot.lane.b32.xlu0 %v45_v8, %s510_s0  ;;  %v210_v57 = vadd.s32 128, %v561_v17  ;;  %v211_v58 = vadd.s32 256, %v561_v17  ;;  %v212_v59 = vadd.s32 384, %v561_v17  ;;  %v213_v61 = vadd.s32 512, %v561_v17 }
  0x22   :  { %v214_v0 = vadd.s32 640, %v561_v17  ;;  %p490_p0 = pnand %p489_p13, %p483_p10 }
  0x24   :  { %v232_v18 = vand.u32 15, %v214_v0 }
  0x25   :  { %78 = vrot.lane.b32.xlu1 %v57_v9, %s510_s0  ;;  %74 = vrot.lane.b32.xlu0 %v49_v10, %s510_s0 }
  0x26   :  { %vm618_vm7 = vcmp.ne.s32.totalorder %v232_v18, 0 }
  0x29   :  { %142 = vrot.lane.b32.xlu1 %v45_v8, %s511_s1  ;;  %82 = vrot.lane.b32.xlu0 %v65_v12, %s510_s0  ;;  %v227_v8 = vand.u32 15, %v561_v17 }
  0x2b   :  { %vm598_vm2 = vcmp.ne.s32.totalorder %v227_v8, 0 }
  0x2d   :  { %146 = vrot.lane.b32.xlu1 %v53_v7, %s511_s1  ;;  %144 = vrot.lane.b32.xlu0 %v49_v10, %s511_s1  ;;  %v229_v10 = vand.u32 15, %v211_v58 }
  0x2f   :  { %vm606_vm4 = vcmp.ne.s32.totalorder %v229_v10, 0 }
  0x31   :  { %152 = vrot.lane.b32.xlu1 %v65_v12, %s511_s1  ;;  %148 = vrot.lane.b32.xlu0 %v57_v9, %s511_s1  ;;  %v228_v9 = vand.u32 15, %v210_v57  ;;  %v230_v12 = vand.u32 15, %v212_v59 }
  0x33   :  { %vm602_vm3 = vcmp.ne.s32.totalorder %v228_v9, 0  ;;  %vm610_vm5 = vcmp.ne.s32.totalorder %v230_v12, 0 }
  0x35   :  { %150 = vrot.lane.b32.xlu1 %v61_v14, %s511_s1  ;;  %80 = vrot.lane.b32.xlu0 %v61_v14, %s510_s0  ;;  %v231_v14 = vand.u32 15, %v213_v61 }
  0x37   :  { %vm614_vm6 = vcmp.ne.s32.totalorder %v231_v14, 0 }
  0x93   :  { %v77_v19 = vpop.permute.xlu1 %76  ;;  %v73_v20 = vpop.permute.xlu0 %72 }
  0x97   :  { %v79_v22 = vpop.permute.xlu1 %78  ;;  %v75_v23 = vpop.permute.xlu0 %74 }
  0x98   :  { %v89_v24 = vsel %vm86_vm0, %v77_v19, %v79_v22  ;;  %v90_v25 = vsel %vm86_vm0, %v75_v23, %v77_v19  ;;  %v91_v30 = vsel %vm86_vm0, %v73_v20, %v75_v23  ;;  %v215_v19 = vand.u32 255, %v561_v17 }
  0x99   :  { %v100_v26 = vcombine.low %v90_v25, %v89_v24 }
  0x9a   :  { %vm622_vm8 = vcmp.ge.s32.totalorder %v215_v19, 16 }
  0x9b   :  { %v115_v27 = vrot.slane %v100_v26, %v564_v21  ;;  %v143_v28 = vpop.permute.xlu1 %142  ;;  %v83_v29 = vpop.permute.xlu0 %82 }
  0x9c   :  { %v92_v31 = vsel %vm86_vm0, %v83_v29, %v73_v20  ;;  %v217_v20 = vand.u32 255, %v211_v58  ;;  %v37_v58 = vld [vmem:[#allocation5] sm:$0x3f] }
  0x9d   :  { %v99_v32 = vcombine.low %v92_v31, %v91_v30  ;;  %v38_v9 = vsub.f32 %v543_v6, %v37_v58 }
  0x9e   :  { %vm626_vm9 = vcmp.ge.s32.totalorder %v217_v20, 16 }
  0x9f   :  { %v108_v33 = vrot.slane %v99_v32, %v564_v21  ;;  %v147_v34 = vpop.permute.xlu1 %146  ;;  %v145_v35 = vpop.permute.xlu0 %144  ;;  %v39_v18 = vmul.f32 %v38_v9, %v38_v9 }
  0xa0   :  { %v158_v40 = vsel %vm154_vm1, %v145_v35, %v147_v34  ;;  %v159_v41 = vsel %vm154_vm1, %v143_v28, %v145_v35 }
  0xa1   :  { %v123_v36 = vcombine.low %v108_v33, %v115_v27 }
  0xa3   :  { %v130_v37 = vrot.slane %v123_v36, %v564_v21  ;;  %v153_v38 = vpop.permute.xlu1 %152  ;;  %v149_v39 = vpop.permute.xlu0 %148 }
  0xa4   :  { %v160_v42 = vsel %vm154_vm1, %v153_v38, %v143_v28  ;;  %v157_v43 = vsel %vm154_vm1, %v147_v34, %v149_v39 }
  0xa5   :  { %v167_v44 = vcombine.low %v160_v42, %v159_v41  ;;  %v168_v45 = vcombine.low %v158_v40, %v157_v43 }
  0xa7   :  { %v176_v46 = vrot.slane %v167_v44, %v564_v21  ;;  %v183_v47 = vrot.slane %v168_v45, %v564_v21  ;;  %v151_v48 = vpop.permute.xlu1 %150  ;;  %v81_v49 = vpop.permute.xlu0 %80 }
  0xa8   :  { %v155_v50 = vsel %vm154_vm1, %v151_v48, %v153_v38  ;;  %v156_v51 = vsel %vm154_vm1, %v149_v39, %v151_v48  ;;  %v87_v52 = vsel %vm86_vm0, %v81_v49, %v83_v29  ;;  %v88_v53 = vsel %vm86_vm0, %v79_v22, %v81_v49 }
  0xa9   :  { %v191_v54 = vcombine.low %v176_v46, %v183_v47  ;;  %v169_v55 = vcombine.low %v156_v51, %v155_v50  ;;  %v101_v56 = vcombine.low %v88_v53, %v87_v52  ;;  %v219_v22 = vand.u32 255, %v213_v61 }
  0xab   :  { %v198_v60 = vrot.slane %v191_v54, %v564_v21  ;;  %v190_v62 = vrot.slane %v169_v55, %v564_v21  ;;  %v122_v63 = vrot.slane %v101_v56, %v564_v21  ;;  %vm630_vm10 = vcmp.ge.s32.totalorder %v219_v22, 16 }
  0xad   :  { %v205_v1 = vrot.slane %v190_v62, %v564_v21  ;;  %v137_v7 = vrot.slane %v122_v63, %v564_v21 }
  0xaf   :  { %v206_v15 = vcombine.low %v198_v60, %v205_v1  ;;  %v138_v16 = vcombine.low %v130_v37, %v137_v7 }
  0xb1   :  { %v208_v23 = vsub.f32 %v543_v6, %v206_v15  ;;  %v140_v24 = vsub.f32 %v543_v6, %v138_v16 }
  0xb3   :  { %v209_v29 = vand.u32 2147483647, %v208_v23  ;;  %v141_v30 = vand.u32 2147483647, %v140_v24  ;;  %v40_v24 = vmul.f32 0.0013020834, %v39_v18 }
  0xb5   :  { %v280_v35 = vrot.slane %v209_v29, %v537_v3  ;;  %v284_v36 = vrot.slane %v209_v29, %v541_v5  ;;  %v288_v37 = vrot.slane %v209_v29, %v535_v2  ;;  %v292_v38 = vrot.slane %v209_v29, %v539_v4 }
  0xb6   :  { %v296_v39 = vrot.slane %v209_v29, %v557_v13  ;;  %v300_v40 = vrot.slane %v209_v29, %v553_v11  ;;  %v243_v41 = vrot.slane %v141_v30, %v537_v3  ;;  %v247_v42 = vrot.slane %v141_v30, %v541_v5 }
  0xb7   :  { %v307_v43 = vsel %vm598_vm2, %v280_v35, 0.0  ;;  %v308_v44 = vsel %vm602_vm3, %v284_v36, 0.0  ;;  %v309_v45 = vsel %vm606_vm4, %v288_v37, 0.0  ;;  %v310_v46 = vsel %vm610_vm5, %v292_v38, 0.0 }
  0xb8   :  { %v311_v47 = vsel %vm614_vm6, %v296_v39, 0.0  ;;  %v312_v48 = vsel %vm618_vm7, %v300_v40, 0.0  ;;  %v251_v49 = vrot.slane %v141_v30, %v535_v2  ;;  %v255_v50 = vrot.slane %v141_v30, %v539_v4 }
  0xb9   :  { %v259_v51 = vrot.slane %v141_v30, %v557_v13  ;;  %v263_v52 = vrot.slane %v141_v30, %v553_v11  ;;  %v270_v53 = vsel %vm622_vm8, %v243_v41, 0.0  ;;  %v314_v54 = vadd.f32 %v308_v44, %v247_v42 }
  0xba   :  { %v272_v55 = vsel %vm626_vm9, %v251_v49, 0.0  ;;  %v313_v56 = vadd.f32 %v307_v43, %v270_v53  ;;  %v316_v57 = vadd.f32 %v310_v46, %v255_v50 }
  0xbb   :  { %v274_v59 = vsel %vm630_vm10, %v259_v51, 0.0  ;;  %v315_v60 = vadd.f32 %v309_v45, %v272_v55  ;;  %v318_v61 = vadd.f32 %v312_v48, %v263_v52  ;;  %v320_v62 = vmul.f32 0.0001, %v314_v54 }
  0xbc   :  { %v317_v63 = vadd.f32 %v311_v47, %v274_v59  ;;  %v319_v0 = vmul.f32 0.0001, %v313_v56  ;;  %v322_v1 = vmul.f32 0.0001, %v316_v57 }
  0xbd   :  { %v321_v7 = vmul.f32 0.0001, %v315_v60  ;;  %v324_v8 = vmul.f32 0.0001, %v318_v61 }
  0xbe   :  { %v323_v10 = vmul.f32 0.0001, %v317_v63  ;;  %v331_v12 = vcombine.low %v319_v0, %v320_v62 }
  0xbf   :  { %v332_v14 = vcombine.low %v321_v7, %v322_v1 }
  0xc0   :  { %v333_v15 = vcombine.low %v323_v10, %v324_v8  ;;  %v340_v16 = vrot.slane %v331_v12, %v564_v21 }
  0xc1   :  { %v347_v19 = vrot.slane %v332_v14, %v564_v21 }
  0xc2   :  { %v354_v20 = vrot.slane %v333_v15, %v564_v21 }
  0xc3   :  { %v355_v22 = vcombine.low %v340_v16, %v347_v19 }
  0xc4   :  { %v369_v23 = vrot.slane %v354_v20, %v564_v21 }
  0xc5   :  { %v362_v25 = vrot.slane %v355_v22, %v564_v21 }
  0xc7   :  { %v370_v26 = vcombine.low %v362_v25, %v369_v23 }
  0xc9   :  { %v372_v27 = vadd.f32 %v370_v26, %v40_v24 }
  0xcb   :  { %v377_v6 = vrot.slane %v372_v27, %v537_v3  ;;  %v381_v17 = vrot.slane %v372_v27, %v541_v5  ;;  %v385_v28 = vrot.slane %v372_v27, %v535_v2  ;;  %v389_v29 = vrot.slane %v372_v27, %v539_v4 }
  0xcc   :  { %v393_v33 = vrot.slane %v372_v27, %v557_v13  ;;  %v397_v35 = vrot.slane %v372_v27, %v553_v11 }
  0xcd   :  { %v405_v30 = vsel %vm404_vm11, %v377_v6, 0.0  ;;  %v406_v31 = vsel %vm404_vm11, %v381_v17, 0.0  ;;  %v408_v21 = vsel %vm404_vm11, %v385_v28, 0.0  ;;  %v410_v3 = vsel %vm404_vm11, %v389_v29, 0.0 }
  0xce   :  { %v407_v32 = vadd.f32 %v406_v31, %v405_v30  ;;  %v412_v5 = vsel %vm404_vm11, %v393_v33, 0.0  ;;  %v414_v4 = vsel %vm404_vm11, %v397_v35, 0.0 }
  0xd0   :  { %v409_v34 = vadd.f32 %v408_v21, %v407_v32 }
  0xd2   :  { %v411_v36 = vadd.f32 %v410_v3, %v409_v34 }
  0xd4   :  { %v413_v2 = vadd.f32 %v412_v5, %v411_v36 }
  0xd6   :  { %v415_v37 = vadd.f32 %v414_v4, %v413_v2 }
  0xd8   :  { %416 = vadd.xlane.f32.xlu0 %v415_v37 }
 0x161   :  { %v417_v13 = vpop.xlane.xlu0 %416 }
 0x162   :  { %419 = vst.msk [vmem:[#allocation7] sm:$0x1] %vm418_vm12, %v417_v13 }
 0x163   :  { %493 = shalt.err (!%p490_p0)
}
 0x164   :  { %429 = dma.vmem_to_hbm [thread:$0]  %s427_s20, 16, %s687_s2, [#allocation4]  }
 0x165   :  { %506 = dma.done.wait [#allocation4], 16  }
 0x166   :  { %507 = vsyncadd [#allocation4], 4294967280 }
 0x167   :  { %433 = vsyncpa [#allocation3], 1 }
 0x168   :  { %434 = vsyncpa [#allocation6], 1 }
 0x169   :  { %435 = vsyncpa [#allocation4], 1 }

</bundles_post_ra>
